<compile_context>
chip_gen: v6e
topology: v6e:2x2x1
jax: 0.10.0
libtpu: 0.0.40
codegen_flags: <defaults>
</compile_context>

<pallas_src>
import jax
import jax.numpy as jnp
from jax.experimental import pallas as pl
from jax.experimental.pallas import tpu as pltpu


def _critic_kernel(x_ref, w1t_ref, b1_ref, w2t_ref, b2_ref, w3_ref, b3_ref,
                   out_ref):
    # x_ref:   (K_pad, TB)   fused [state; action] columns (feats folded into W1)
    # w1t_ref: (H1, K_pad)   b1_ref: (H1, 1)
    # w2t_ref: (H2, H1)      b2_ref: (H2, 1)
    # w3_ref:  (H2, 1)       b3_ref: (1, 1)
    # out_ref: (1, TB)
    h = jnp.dot(w1t_ref[...], x_ref[...],
                preferred_element_type=jnp.float32) + b1_ref[...]      # (H1, TB)
    h = jnp.maximum(h, 0.0)

    h = jnp.dot(w2t_ref[...], h,
                preferred_element_type=jnp.float32) + b2_ref[...]      # (H2, TB)
    h = jnp.maximum(h, 0.0)

    # Final H2 -> 1 projection on VPU + XLU (exact f32), avoiding an M=1 MXU pass.
    out_ref[...] = (jnp.sum(h * w3_ref[...], axis=0, keepdims=True)
                    + b3_ref[...])                                      # (1, TB)


def _round_up(x: int, m: int) -> int:
    return (x + m - 1) // m * m


def _ceil_div(a: int, b: int) -> int:
    return -(-a // b)


def _choose_tile(batch: int, max_tb: int) -> tuple[int, int]:
    """Pick a lane-axis batch tile (multiple of 128) and padded batch size.

    Keeps >=2 grid steps once there is enough work (v7x megacore sharding) and
    balances the tile against B so padding waste stays minimal.
    """
    b128 = _round_up(batch, 128)
    n_steps = max(_ceil_div(b128, max_tb), 2 if b128 >= 256 else 1)
    tb = _round_up(_ceil_div(b128, n_steps), 128)
    b_pad = _round_up(b128, tb)
    return tb, b_pad


def critic_forward(state, action, params, *, max_tb=16384):
    """state: (B, 1) f32, action: (B, A) f32 -> (B, 1) f32."""
    B = state.shape[0]
    A = action.shape[1]
    H1 = params["w1"].shape[1]
    H2 = params["w2"].shape[1]
    K = 1 + A
    K_pad = _round_up(K, 8)

    # ---- trace-time folding of feats Linear(1,1) into the first MLP layer ----
    #   cat([w0*state + b0, action]) @ W1 + b1
    #     == cat([state, action]) @ [[w0*W1[0:1]], [W1[1:]]] + (b1 + b0*W1[0:1])
    w1_eff = jnp.concatenate(
        [params["w0"][0, 0] * params["w1"][0:1, :], params["w1"][1:, :]], axis=0)  # (K, H1)
    b1_eff = params["b1"] + params["b0"][0, 0] * params["w1"][0:1, :]              # (1, H1)
    if K_pad != K:
        w1_eff = jnp.pad(w1_eff, ((0, K_pad - K), (0, 0)))                         # zero rows

    # Transposed weights / biases so the batch sits on the lane axis in-kernel.
    w1t = w1_eff.T                      # (H1, K_pad)
    b1t = b1_eff.T                      # (H1, 1)
    w2t = params["w2"].T                # (H2, H1)
    b2t = params["b2"].T                # (H2, 1)
    w3 = params["w3"]                   # (H2, 1)
    b3 = params["b3"]                   # (1, 1)

    # ---- lane-axis batch tiling ----
    TB, B_pad = _choose_tile(B, max_tb)
    grid = (B_pad // TB,)

    # Fused, transposed, zero-padded input: (K_pad, B_pad).
    x = jnp.concatenate([state, action], axis=-1).astype(jnp.float32)   # (B, K)
    x_t = jnp.pad(x.T, ((0, K_pad - K), (0, B_pad - B)))                 # (K_pad, B_pad)

    def wspec(shape):
        # full-array weight/bias tile, same block every grid step
        return pl.BlockSpec(shape, lambda i: (0, 0))

    out = pl.pallas_call(
        _critic_kernel,
        out_shape=jax.ShapeDtypeStruct((1, B_pad), jnp.float32),
        grid=grid,
        in_specs=[
            pl.BlockSpec((K_pad, TB), lambda i: (0, i)),   # fused [state; action]
            wspec((H1, K_pad)),                            # W1ᵀ (feats folded)
            wspec((H1, 1)),                                # b1ᵀ
            wspec((H2, H1)),                               # W2ᵀ
            wspec((H2, 1)),                                # b2ᵀ
            wspec((H2, 1)),                                # w3
            wspec((1, 1)),                                 # b3
        ],
        out_specs=pl.BlockSpec((1, TB), lambda i: (0, i)),
        compiler_params=pltpu.CompilerParams(
            dimension_semantics=("parallel",)),
    )(x_t, w1t, b1t, w2t, b2t, w3, b3)

    return out[0, :B][:, None]                                           # (B, 1)


def _init_params(key, action_size, hiddens):
    """Deterministic synthetic parameters matching the PyTorch module shapes."""
    d_in = 1 + action_size                      # critic_feat_size (=1) + action_size
    h1, h2 = hiddens
    ks = jax.random.split(key, 8)
    return {
        # feats: Linear(1, 1)
        "w0": jax.random.normal(ks[0], (1, 1), jnp.float32) * 0.5,
        "b0": jax.random.normal(ks[1], (1, 1), jnp.float32) * 0.1,
        # mlp: Linear(d_in, h1) -> ReLU -> Linear(h1, h2) -> ReLU -> Linear(h2, 1)
        "w1": jax.random.normal(ks[2], (d_in, h1), jnp.float32) * (1.0 / jnp.sqrt(d_in)),
        "b1": jax.random.normal(ks[3], (1, h1), jnp.float32) * 0.1,
        "w2": jax.random.normal(ks[4], (h1, h2), jnp.float32) * (1.0 / jnp.sqrt(h1)),
        "b2": jax.random.normal(ks[5], (1, h2), jnp.float32) * 0.1,
        "w3": jax.random.normal(ks[6], (h2, 1), jnp.float32) * (1.0 / jnp.sqrt(h2)),
        "b3": jax.random.normal(ks[7], (1, 1), jnp.float32) * 0.1,
    }


def _reference(state, action, p):
    s = state * p["w0"][0, 0] + p["b0"][0, 0]
    x = jnp.concatenate([s, action], axis=-1)
    x = jnp.maximum(x @ p["w1"] + p["b1"], 0.0)
    x = jnp.maximum(x @ p["w2"] + p["b2"], 0.0)
    return x @ p["w3"] + p["b3"]


if __name__ == "__main__":
    key = jax.random.PRNGKey(0)
    k_state, k_action, k_params = jax.random.split(key, 3)

    batch = 8
    action_size = 7          # config.action_size
    hiddens = (32, 32)       # config.critic_mlp_hiddens; critic_feat_size == 1

    state = jax.random.normal(k_state, (batch, 1), jnp.float32)
    action = jax.random.normal(k_action, (batch, action_size), jnp.float32)
    params = _init_params(k_params, action_size, hiddens)

    out = critic_forward(state, action, params)
    out = jax.block_until_ready(out)

    ref = _reference(state, action, params)
    assert out.shape == (batch, 1)
    assert jnp.allclose(out, ref, atol=1e-5, rtol=1e-5)

    print("KERNEL_OK")
</pallas_src>

<mosaic_0001>
module attributes {stable_mosaic.version = 11 : i64} {
  func.func @_critic_kernel(%arg0: i32, %arg1: memref<8x128xf32, #tpu.memory_space<vmem>>, %arg2: memref<32x8xf32, #tpu.memory_space<vmem>>, %arg3: memref<32x1xf32, #tpu.memory_space<vmem>>, %arg4: memref<32x32xf32, #tpu.memory_space<vmem>>, %arg5: memref<32x1xf32, #tpu.memory_space<vmem>>, %arg6: memref<32x1xf32, #tpu.memory_space<vmem>>, %arg7: memref<1x1xf32, #tpu.memory_space<vmem>>, %arg8: memref<1x128xf32, #tpu.memory_space<vmem>>) attributes {dimension_semantics = [#tpu.dimension_semantics<parallel>], iteration_bounds = array<i64: 1>, scalar_prefetch = 0 : i64, scratch_operands = 0 : i64, tpu.core_type = #tpu.core_type<tc>, window_params = [{transform_indices = @transform_0, window_bounds = array<i64: 8, 128>}, {pipeline_mode = #tpu.pipeline_mode<synchronous>, transform_indices = @transform_1, window_bounds = array<i64: 32, 8>}, {pipeline_mode = #tpu.pipeline_mode<synchronous>, transform_indices = @transform_2, window_bounds = array<i64: 32, 1>}, {pipeline_mode = #tpu.pipeline_mode<synchronous>, transform_indices = @transform_3, window_bounds = array<i64: 32, 32>}, {pipeline_mode = #tpu.pipeline_mode<synchronous>, transform_indices = @transform_4, window_bounds = array<i64: 32, 1>}, {pipeline_mode = #tpu.pipeline_mode<synchronous>, transform_indices = @transform_5, window_bounds = array<i64: 32, 1>}, {pipeline_mode = #tpu.pipeline_mode<synchronous>, transform_indices = @transform_6, window_bounds = array<i64: 1, 1>}, {transform_indices = @transform_7, window_bounds = array<i64: 1, 128>}]} {
    %c0 = arith.constant 0 : index
    %c0_0 = arith.constant 0 : index
    %0 = vector.load %arg2[%c0, %c0_0] : memref<32x8xf32, #tpu.memory_space<vmem>>, vector<32x8xf32>
    %c0_1 = arith.constant 0 : index
    %c0_2 = arith.constant 0 : index
    %1 = vector.load %arg1[%c0_1, %c0_2] : memref<8x128xf32, #tpu.memory_space<vmem>>, vector<8x128xf32>
    %cst = arith.constant dense<0.000000e+00> : vector<32x128xf32>
    %2 = tpu.matmul %0, %1, %cst {dimension_numbers = #tpu.dot_dimension_numbers<[1], [0], [0], [1], [0, 0, 1, 1], [], []>} : vector<32x8xf32>, vector<8x128xf32>, vector<32x128xf32> -> vector<32x128xf32>
    %c0_3 = arith.constant 0 : index
    %c0_4 = arith.constant 0 : index
    %3 = vector.load %arg3[%c0_3, %c0_4] : memref<32x1xf32, #tpu.memory_space<vmem>>, vector<32x1xf32>
    %4 = vector.broadcast %3 : vector<32x1xf32> to vector<32x128xf32>
    %5 = arith.addf %2, %4 : vector<32x128xf32>
    %cst_5 = arith.constant 0.000000e+00 : f32
    %6 = vector.broadcast %cst_5 : f32 to vector<32x128xf32>
    %7 = arith.maximumf %5, %6 : vector<32x128xf32>
    %c0_6 = arith.constant 0 : index
    %c0_7 = arith.constant 0 : index
    %8 = vector.load %arg4[%c0_6, %c0_7] : memref<32x32xf32, #tpu.memory_space<vmem>>, vector<32x32xf32>
    %cst_8 = arith.constant dense<0.000000e+00> : vector<32x128xf32>
    %9 = tpu.matmul %8, %7, %cst_8 {dimension_numbers = #tpu.dot_dimension_numbers<[1], [0], [0], [1], [0, 0, 1, 1], [], []>} : vector<32x32xf32>, vector<32x128xf32>, vector<32x128xf32> -> vector<32x128xf32>
    %c0_9 = arith.constant 0 : index
    %c0_10 = arith.constant 0 : index
    %10 = vector.load %arg5[%c0_9, %c0_10] : memref<32x1xf32, #tpu.memory_space<vmem>>, vector<32x1xf32>
    %11 = vector.broadcast %10 : vector<32x1xf32> to vector<32x128xf32>
    %12 = arith.addf %9, %11 : vector<32x128xf32>
    %cst_11 = arith.constant 0.000000e+00 : f32
    %13 = vector.broadcast %cst_11 : f32 to vector<32x128xf32>
    %14 = arith.maximumf %12, %13 : vector<32x128xf32>
    %c0_12 = arith.constant 0 : index
    %c0_13 = arith.constant 0 : index
    %15 = vector.load %arg6[%c0_12, %c0_13] : memref<32x1xf32, #tpu.memory_space<vmem>>, vector<32x1xf32>
    %16 = vector.broadcast %15 : vector<32x1xf32> to vector<32x128xf32>
    %17 = arith.mulf %14, %16 : vector<32x128xf32>
    %cst_14 = arith.constant dense<0.000000e+00> : vector<128xf32>
    %18 = vector.multi_reduction <add>, %17, %cst_14 [0] : vector<32x128xf32> to vector<128xf32>
    %19 = vector.shape_cast %18 : vector<128xf32> to vector<1x128xf32>
    %c0_15 = arith.constant 0 : index
    %c0_16 = arith.constant 0 : index
    %20 = vector.load %arg7[%c0_15, %c0_16] : memref<1x1xf32, #tpu.memory_space<vmem>>, vector<1x1xf32>
    %21 = vector.broadcast %20 : vector<1x1xf32> to vector<1x128xf32>
    %22 = arith.addf %19, %21 : vector<1x128xf32>
    %c0_17 = arith.constant 0 : index
    %c0_18 = arith.constant 0 : index
    %23 = vector.load %arg8[%c0_17, %c0_18] : memref<1x128xf32, #tpu.memory_space<vmem>>, vector<1x128xf32>
    tpu.vector_store %arg8[%c0_17, %c0_18], %22 {strides = array<i32>} : memref<1x128xf32, #tpu.memory_space<vmem>>, vector<1x128xf32>,
    return
  }
  func.func @transform_0(%arg0: i32) -> (i32, i32) {
    %c0_i32 = arith.constant 0 : i32
    %c0_i32_0 = arith.constant 0 : i32
    return %c0_i32, %arg0 : i32, i32
  }
  func.func @transform_1(%arg0: i32) -> (i32, i32) {
    %c0_i32 = arith.constant 0 : i32
    %c0_i32_0 = arith.constant 0 : i32
    %c0_i32_1 = arith.constant 0 : i32
    return %c0_i32, %c0_i32_0 : i32, i32
  }
  func.func @transform_2(%arg0: i32) -> (i32, i32) {
    %c0_i32 = arith.constant 0 : i32
    %c0_i32_0 = arith.constant 0 : i32
    %c0_i32_1 = arith.constant 0 : i32
    return %c0_i32, %c0_i32_0 : i32, i32
  }
  func.func @transform_3(%arg0: i32) -> (i32, i32) {
    %c0_i32 = arith.constant 0 : i32
    %c0_i32_0 = arith.constant 0 : i32
    %c0_i32_1 = arith.constant 0 : i32
    return %c0_i32, %c0_i32_0 : i32, i32
  }
  func.func @transform_4(%arg0: i32) -> (i32, i32) {
    %c0_i32 = arith.constant 0 : i32
    %c0_i32_0 = arith.constant 0 : i32
    %c0_i32_1 = arith.constant 0 : i32
    return %c0_i32, %c0_i32_0 : i32, i32
  }
  func.func @transform_5(%arg0: i32) -> (i32, i32) {
    %c0_i32 = arith.constant 0 : i32
    %c0_i32_0 = arith.constant 0 : i32
    %c0_i32_1 = arith.constant 0 : i32
    return %c0_i32, %c0_i32_0 : i32, i32
  }
  func.func @transform_6(%arg0: i32) -> (i32, i32) {
    %c0_i32 = arith.constant 0 : i32
    %c0_i32_0 = arith.constant 0 : i32
    %c0_i32_1 = arith.constant 0 : i32
    return %c0_i32, %c0_i32_0 : i32, i32
  }
  func.func @transform_7(%arg0: i32) -> (i32, i32) {
    %c0_i32 = arith.constant 0 : i32
    %c0_i32_0 = arith.constant 0 : i32
    return %c0_i32, %arg0 : i32, i32
  }
}

</mosaic_0001>

<bundles_post_ra>
// kernel: tpu_custom_call.1
= control target key start
LH: loop header
LB: loop body
LE: loop exit
PB: predicated region body
PF: predicated region fallthrough
CT: control target
= control target key end

     0   :  { %s549_s0 = inlined_call_operand.vmem [shape: f32[8,128], index: 0, kind: input, shape index: {}]   ;;  %s550_s1 = inlined_call_operand.vmem [shape: f32[32,8], index: 1, kind: input, shape index: {}]   ;;  %s551_s2 = inlined_call_operand.vmem [shape: f32[32,1], index: 2, kind: input, shape index: {}]   ;;  %s552_s3 = inlined_call_operand.vmem [shape: f32[32,32], index: 3, kind: input, shape index: {}]   ;;  %s553_s4 = inlined_call_operand.vmem [shape: f32[32,1], index: 4, kind: input, shape index: {}]   ;;  %s554_s5 = inlined_call_operand.vmem [shape: f32[32,1], index: 5, kind: input, shape index: {}]   ;;  %s555_s6 = inlined_call_operand.<no memory space> [shape: f32[1,1], index: 6, kind: input, shape index: {}]   ;;  %s556_s7 = inlined_call_operand.hbm [shape: f32[1,128], index: 7, kind: output, shape index: {}]  }
   0x1   :  { %v12_v0 = vstv %s555_s6 }
   0x2   :  { %13 = vst [vmem:[#allocation2] sm:$0x1] %v12_v0 }
   0x3   :  { %v33_v1 = vld [vmem:[%s549_s0] sm:$0xff]  ;;  %vm58_vm0 = vcmask 64512   ;;  %v30_v3 = vld [vmem:[%s550_s1 + $0x8] sm:$0xff]  ;;  %v31_v4 = vld [vmem:[%s550_s1 + $0x10] sm:$0xff]  ;;  %v430_v6 = vmov 0  }
   0x4   :  { %v29_v2 = vld [vmem:[%s550_s1] sm:$0xff]  ;;  %374 = vmatprep.subr.mxu0 %v33_v1  ;;  %v37_v5 = vld [vmem:[%s551_s2 + $0x18] sm:$0xff]  ;;  %406 = vset.pattern.permute.xlu0 %v430_v6  ;;  %v35_v7 = vld [vmem:[%s551_s2 + $0x8] sm:$0xff] }
   0x5   :  { %376 = vmatprep.mubr.msk.f32.mxu0 %vm58_vm0, %v29_v2  ;;  %375 = vmatpush3.msra.mxu0 %v33_v1  ;;  %v32_v8 = vld [vmem:[%s550_s1 + $0x18] sm:$0xff]  ;;  %v36_v9 = vld [vmem:[%s551_s2 + $0x10] sm:$0xff]  ;;  %v34_v10 = vld [vmem:[%s551_s2] sm:$0xff] }
   0x6   :  { %377 = vmatmul.mubr.msk.f32.vlgmr.msra.gmra.mxu0 %vm58_vm0, %v30_v3  ;;  %55 = vperm.xlu0 %406, %v37_v5  }
   0x7   :  { %379 = vmatprep.mubr.msk.f32.mxu0 %vm58_vm0, %v31_v4  ;;  %407 = vset.pattern.permute.xlu1 %v430_v6 }
   0x8   :  { %45 = vperm.xlu1 %407, %v35_v7  }
   0x9   :  { %14 = vsyncpa [#allocation4], 0  ;;  %v164_v11 = vld [vmem:[%s553_s4] sm:$0xff]  ;;  %v165_v12 = vld [vmem:[%s553_s4 + $0x8] sm:$0xff]  ;;  %vm188_vm1 = vcmask 261120   ;;  %v333_v2 = vlaneseq }
   0xa   :  { %380 = vmatmul.mubr.msk.f32.gmra.mxu0 %vm58_vm0, %v32_v8  ;;  %50 = vperm.xlu0 %406, %v36_v9   ;;  %v166_v13 = vld [vmem:[%s553_s4 + $0x10] sm:$0xff]  ;;  %v167_v14 = vld [vmem:[%s553_s4 + $0x18] sm:$0xff]  ;;  %v290_v15 = vld [vmem:[%s554_s5] sm:$0xff] }
   0xb   :  { %v291_v16 = vld [vmem:[%s554_s5 + $0x8] sm:$0xff]  ;;  %v292_v17 = vld [vmem:[%s554_s5 + $0x10] sm:$0xff]  ;;  %v293_v18 = vld [vmem:[%s554_s5 + $0x18] sm:$0xff]  ;;  %v334_v5 = vshrl.u32 %v333_v2, 7 }
   0xc   :  { %40 = vperm.xlu1 %407, %v34_v10   ;;  %v327_v19 = vld [vmem:[#allocation2] sm:$0x1]  ;;  %v162_v21 = vld [vmem:[%s552_s3 + $0x10] sm:$0xff]  ;;  %v161_v38 = vld [vmem:[%s552_s3 + $0x8] sm:$0xff] }
   0xd   :  { %v160_v20 = vld [vmem:[%s552_s3] sm:$0xff]  ;;  %393 = vmatprep.mubr.msk.f32.mxu1 %vm188_vm1, %v162_v21  ;;  %v163_v39 = vld [vmem:[%s552_s3 + $0x18] sm:$0xff]  ;;  %v335_v8 = vsub.s32 0, %v334_v5  ;;  %s431_s3 = smov [#allocation3]  }
   0xe   :  { %170 = vperm.xlu0 %406, %v164_v11   ;;  %390 = vmatprep.mubr.msk.f32.mxu0 %vm188_vm1, %v160_v20  ;;  %s345_s14 = sshll.u32 %s431_s3, 4  ;;  %s346_s14 = int_to_ptr.vmem [resolvable:$true] %s345_s14 }
   0xf   :  { %s408_s15 = scalar_lea.vmem %s346_s14, 16  ;;  %s412_s16 = scalar_lea.vmem %s346_s14, 32 }
  0x10   :  { %175 = vperm.xlu1 %407, %v165_v12   ;;  %p409_p0 = scmp.ne.s32.totalorder %s346_s14, %s408_s15  ;;  %p413_p1 = scmp.lt.s32.totalorder %s346_s14, %s346_s14 }
  0x11   :  { %p414_p2 = scmp.lt.s32.totalorder %s412_s16, %s408_s15 }
  0x12   :  { %180 = vperm.xlu0 %406, %v166_v13  }
  0x13   :  { %p415_p3 = por %p414_p2, %p413_p1 }
  0x14   :  { %185 = vperm.xlu1 %407, %v167_v14  }
  0x15   :  { %p416_p4 = pnand %p415_p3, %p409_p0 }
  0x16   :  { %296 = vperm.xlu0 %406, %v290_v15  }
  0x18   :  { %301 = vperm.xlu1 %407, %v291_v16  }
  0x1a   :  { %306 = vperm.xlu0 %406, %v292_v17  }
  0x1c   :  { %311 = vperm.xlu1 %407, %v293_v18  }
  0x1e   :  { %330 = vperm.xlu0 %406, %v327_v19  }
  0x81   :  { %v56_v22 = vpop.permute.xlu0 %55 }
  0x83   :  { %v46_v24 = vpop.permute.xlu1 %45 }
  0x85   :  { %v51_v28 = vpop.permute.xlu0 %50 }
  0x87   :  { %v41_v33 = vpop.permute.xlu1 %40 }
  0x89   :  { %v171_v40 = vpop.permute.xlu0 %170 }
  0x8b   :  { %v176_v41 = vpop.permute.xlu1 %175 }
  0x8d   :  { %v181_v42 = vpop.permute.xlu0 %180 }
  0x8f   :  { %v186_v43 = vpop.permute.xlu1 %185 }
  0x91   :  { %v297_v46 = vpop.permute.xlu0 %296 }
  0x93   :  { %v302_v54 = vpop.permute.xlu1 %301 }
  0x95   :  { %v307_v60 = vpop.permute.xlu0 %306 }
  0x97   :  { %v312_v63 = vpop.permute.xlu1 %311 }
  0x99   :  { %v331_v10 = vpop.permute.xlu0 %330 }
  0x9a   :  { %v336_v12 = vrot.slane %v331_v10, %v335_v8 }
  0xc6   :  { %v378_v23 = vpop.f32.mrf.mxu0 }
  0xc7   :  { %v143_v30 = vadd.f32 %v378_v23, %v46_v24 }
  0xc8   :  { %v137_v25 = vpop.f32.mrf.mxu0 }
  0xc9   :  { %v138_v34 = vadd.f32 %v137_v25, %v41_v33  ;;  %v157_v36 = vmax.f32 %v143_v30, 0.0 }
  0xca   :  { %v381_v26 = vpop.f32.mrf.mxu0 }
  0xcb   :  { %v153_v27 = vadd.f32 %v381_v26, %v56_v22  ;;  %v156_v37 = vmax.f32 %v138_v34, 0.0 }
  0xcc   :  { %v147_v29 = vpop.f32.mrf.mxu0 }
  0xcd   :  { %v159_v31 = vmax.f32 %v153_v27, 0.0  ;;  %v148_v32 = vadd.f32 %v147_v29, %v51_v28 }
  0xcf   :  { %v158_v35 = vmax.f32 %v148_v32, 0.0  ;;  %382 = vmatprep.subr.mxu0 %v159_v31  ;;  %396 = vmatprep.subr.mxu1 %v159_v31 }
  0xd0   :  { %383 = vmatpush3.msra.mxu0 %v159_v31  ;;  %400 = vmatpush3.msra.mxu1 %v159_v31 }
  0xd1   :  { %384 = vmatprep.subr.mxu0 %v158_v35  ;;  %397 = vmatprep.subr.mxu1 %v158_v35 }
  0xd2   :  { %385 = vmatpush3.msra.mxu0 %v158_v35  ;;  %401 = vmatpush3.msra.mxu1 %v158_v35 }
  0xd3   :  { %386 = vmatprep.subr.mxu0 %v157_v36  ;;  %398 = vmatprep.subr.mxu1 %v157_v36 }
  0xd4   :  { %387 = vmatpush3.msra.mxu0 %v157_v36  ;;  %402 = vmatpush3.msra.mxu1 %v157_v36 }
  0xd5   :  { %388 = vmatprep.subr.mxu0 %v156_v37  ;;  %399 = vmatprep.subr.mxu1 %v156_v37 }
  0xd6   :  { %389 = vmatpush3.msra.mxu0 %v156_v37  ;;  %403 = vmatpush3.msra.mxu1 %v156_v37 }
  0xd7   :  { %391 = vmatmul.mubr.msk.f32.vlgmr.msra.gmra.mxu0 %vm188_vm1, %v161_v38  ;;  %394 = vmatmul.mubr.msk.f32.vlgmr.msra.gmra.mxu1 %vm188_vm1, %v163_v39 }
 0x197   :  { %v392_v44 = vpop.f32.mrf.mxu0  ;;  %v395_v45 = vpop.f32.mrf.mxu1 }
 0x198   :  { %v273_v47 = vadd.f32 %v392_v44, %v176_v41  ;;  %v283_v51 = vadd.f32 %v395_v45, %v186_v43 }
 0x199   :  { %v267_v48 = vpop.f32.mrf.mxu0  ;;  %v277_v49 = vpop.f32.mrf.mxu1 }
 0x19a   :  { %v287_v50 = vmax.f32 %v273_v47, 0.0  ;;  %v268_v52 = vadd.f32 %v267_v48, %v171_v40  ;;  %v278_v53 = vadd.f32 %v277_v49, %v181_v42  ;;  %v289_v58 = vmax.f32 %v283_v51, 0.0 }
 0x19c   :  { %v286_v55 = vmax.f32 %v268_v52, 0.0  ;;  %v288_v56 = vmax.f32 %v278_v53, 0.0  ;;  %v315_v57 = vmul.f32 %v302_v54, %v287_v50  ;;  %v317_v0 = vmul.f32 %v312_v63, %v289_v58 }
 0x19e   :  { %v314_v59 = vmul.f32 %v297_v46, %v286_v55  ;;  %v316_v62 = vmul.f32 %v307_v60, %v288_v56 }
 0x1a0   :  { %v318_v61 = vadd.f32 %v315_v57, %v314_v59 }
 0x1a2   :  { %v319_v1 = vadd.f32 %v318_v61, %v316_v62 }
 0x1a4   :  { %v320_v3 = vadd.f32 %v319_v1, %v317_v0 }
 0x1a6   :  { %v321_v4 = vrot.slane %v320_v3, 4 }
 0x1a8   :  { %v322_v6 = vadd.f32 %v321_v4, %v320_v3 }
 0x1aa   :  { %v323_v7 = vrot.slane %v322_v6, 2 }
 0x1ac   :  { %v324_v9 = vadd.f32 %v323_v7, %v322_v6 }
 0x1ae   :  { %v325_v11 = vrot.slane %v324_v9, 1 }
 0x1b0   :  { %v326_v13 = vadd.f32 %v325_v11, %v324_v9 }
 0x1b2   :  { %v337_v14 = vadd.f32 %v336_v12, %v326_v13 }
 0x1b4   :  { %338 = vst [vmem:[#allocation3] sm:$0x1] %v337_v14 }
 0x1b5   :  { %419 = shalt.err (!%p416_p4)
}
 0x1b6   :  { %348 = dma.vmem_to_hbm [thread:$0]  %s346_s14, 16, %s556_s7, [#allocation4]  }
 0x1b7   :  { %428 = dma.done.wait [#allocation4], 16  }
 0x1b8   :  { %429 = vsyncadd [#allocation4], 4294967280 }
 0x1b9   :  { %352 = vsyncpa [#allocation4], 1 }

</bundles_post_ra>
